<compile_context>
chip_gen: v6e
topology: v6e:2x2x1
jax: 0.10.0
libtpu: 0.0.40
codegen_flags: <defaults>
</compile_context>

<pallas_src>
import math

import jax
import jax.numpy as jnp
from jax.experimental import pallas as pl
from jax.experimental.pallas import tpu as pltpu

SELU_ALPHA = 1.6732632423543772
SELU_SCALE = 1.0507009873554805

H1, H2, H3, H4 = 128, 64, 32, 16


def _selu(x):
    # selu(x) = scale * (x             , x > 0
    #                    alpha*(e^x - 1), x <= 0)
    # Clamp the exp argument so the discarded branch never overflows to inf.
    neg = jnp.minimum(x, 0.0)
    return SELU_SCALE * jnp.where(x > 0, x, SELU_ALPHA * (jnp.exp(neg) - 1.0))


def _round_up(x, m):
    return -(-x // m) * m


def _make_critic_kernel(n_states, half):
    """Kernel factory; `half` = rows per independent sub-chain (ILP split)."""

    def kernel(x_ref, w1_ref, w2a_ref, w2b_ref, w3_ref, w4_ref, w5_ref,
               b_ref, out_ref):
        w1 = w1_ref[...]
        w2a = w2a_ref[...]
        w2b = w2b_ref[...]
        w3 = w3_ref[...]
        w4 = w4_ref[...]
        w5 = w5_ref[...]
        b1 = b_ref[0:1, :H1]
        b2 = b_ref[1:2, :H2]
        b3 = b_ref[2:3, :H3]
        b4 = b_ref[3:4, :H4]
        b5 = b_ref[4:5, :1]

        def chain(x):
            s = x[:, :n_states]          # lane slice of the fused input
            a = x[:, n_states:]
            h1 = _selu(jnp.dot(s, w1, preferred_element_type=jnp.float32) + b1)
            # cat([h1, a], 1) @ w2  ==  h1 @ w2a + a @ w2b   (concat folded)
            h2 = _selu(jnp.dot(h1, w2a, preferred_element_type=jnp.float32)
                       + jnp.dot(a, w2b, preferred_element_type=jnp.float32)
                       + b2)
            h3 = _selu(jnp.dot(h2, w3, preferred_element_type=jnp.float32) + b3)
            h4 = _selu(jnp.dot(h3, w4, preferred_element_type=jnp.float32) + b4)
            return _selu(jnp.dot(h4, w5, preferred_element_type=jnp.float32)
                         + b5)

        x = x_ref[...]
        # Two independent dataflows in one basic block -> the LLO scheduler can
        # co-issue one half's vmatmul with the other half's SELU (VPU/EUP).
        out_ref[0:half, :] = chain(x[0:half, :])
        out_ref[half:, :] = chain(x[half:, :])

    return kernel


@jax.jit
def critic_forward(states, actions, params):
    w1, w2a, w2b, w3, w4, w5, bias = params
    B, n_states = states.shape
    n_actions = actions.shape[1]
    n_in = n_states + n_actions

    # Batch tile: big enough to amortize ~0.35us/grid-step, but >=2 grid steps
    # for large batches so v7x's two TensorCores both get work.  Multiple of 16
    # so each half-tile stays sublane(8)-aligned.
    if B >= 512:
        TB = min(1024, _round_up(pl.cdiv(B, 2), 16))
    else:
        TB = _round_up(B, 16)
    Bp = _round_up(B, TB)
    grid = (Bp // TB,)

    # Fuse states/actions into one operand (halves the tiny per-step DMAs) and
    # zero-pad the batch up to a multiple of the tile (padded rows dropped).
    x = jnp.concatenate([states, actions], axis=1)
    if Bp != B:
        x = jnp.pad(x, ((0, Bp - B), (0, 0)))

    def full_spec(arr):                  # resident operand, constant index map
        return pl.BlockSpec(arr.shape, lambda i: (0, 0))

    out = pl.pallas_call(
        _make_critic_kernel(n_states, TB // 2),
        out_shape=jax.ShapeDtypeStruct((Bp, 1), jnp.float32),
        grid=grid,
        in_specs=[pl.BlockSpec((TB, n_in), lambda i: (i, 0)),
                  full_spec(w1), full_spec(w2a), full_spec(w2b),
                  full_spec(w3), full_spec(w4), full_spec(w5),
                  full_spec(bias)],
        out_specs=pl.BlockSpec((TB, 1), lambda i: (i, 0)),
        compiler_params=pltpu.CompilerParams(
            dimension_semantics=("parallel",)),
    )(x, w1, w2a, w2b, w3, w4, w5, bias)

    return out[:B]                       # (B, 1); drop padded rows


def init_critic_params(key, n_states, n_actions):
    """Mirrors Critic.reset_parameters().

    layer_init uses weight.size()[0] == out_features, so lim = 1/sqrt(out)
    for fc1..fc4, 0.003 for fc5; every bias is 0.1.  Weights are stored
    pre-transposed to (in, out); fc2's weight is split at the concat boundary;
    the five biases are packed into one (8, 128) zero-padded operand.
    """
    k1, k2, k3, k4, k5 = jax.random.split(key, 5)

    def unif(k, shape, lim):
        return jax.random.uniform(k, shape, jnp.float32, minval=-lim, maxval=lim)

    w1 = unif(k1, (n_states, H1), 1.0 / math.sqrt(H1))
    w2 = unif(k2, (H1 + n_actions, H2), 1.0 / math.sqrt(H2))
    w2a, w2b = w2[:H1, :], w2[H1:, :]
    w3 = unif(k3, (H2, H3), 1.0 / math.sqrt(H3))
    w4 = unif(k4, (H3, H4), 1.0 / math.sqrt(H4))
    w5 = unif(k5, (H4, 1), 0.003)

    bias = jnp.zeros((8, 128), jnp.float32)
    bias = bias.at[0, :H1].set(0.1)
    bias = bias.at[1, :H2].set(0.1)
    bias = bias.at[2, :H3].set(0.1)
    bias = bias.at[3, :H4].set(0.1)
    bias = bias.at[4, :1].set(0.1)

    return (w1, w2a, w2b, w3, w4, w5, bias)


def critic_reference(states, actions, params):
    """Pure-JAX reference for verification (full-precision matmuls)."""
    w1, w2a, w2b, w3, w4, w5, bias = params
    b1, b2, b3, b4 = bias[0, :H1], bias[1, :H2], bias[2, :H3], bias[3, :H4]
    b5 = bias[4, :1]
    with jax.default_matmul_precision("highest"):
        h1 = jax.nn.selu(states @ w1 + b1)
        x = jnp.concatenate([h1, actions], axis=1)
        h2 = jax.nn.selu(x @ jnp.concatenate([w2a, w2b], axis=0) + b2)
        h3 = jax.nn.selu(h2 @ w3 + b3)
        h4 = jax.nn.selu(h3 @ w4 + b4)
        return jax.nn.selu(h4 @ w5 + b5)


if __name__ == "__main__":
    n_states, n_actions, batch = 16, 8, 16

    key = jax.random.PRNGKey(0)
    k_s, k_a, k_p = jax.random.split(key, 3)
    states = jax.random.normal(k_s, (batch, n_states), jnp.float32)
    actions = jax.random.uniform(k_a, (batch, n_actions), jnp.float32,
                                 minval=-1.0, maxval=1.0)
    params = init_critic_params(k_p, n_states, n_actions)

    out = critic_forward(states, actions, params)
    out = jax.block_until_ready(out)

    ref = critic_reference(states, actions, params)
    assert out.shape == (batch, 1), out.shape
    assert jnp.allclose(out, ref, atol=1e-4, rtol=1e-4), \
        float(jnp.max(jnp.abs(out - ref)))

    print("KERNEL_OK")
</pallas_src>

<mosaic_0001>
module attributes {stable_mosaic.version = 11 : i64} {
  func.func @kernel(%arg0: i32, %arg1: memref<16x24xf32, #tpu.memory_space<vmem>>, %arg2: memref<16x128xf32, #tpu.memory_space<vmem>>, %arg3: memref<128x64xf32, #tpu.memory_space<vmem>>, %arg4: memref<8x64xf32, #tpu.memory_space<vmem>>, %arg5: memref<64x32xf32, #tpu.memory_space<vmem>>, %arg6: memref<32x16xf32, #tpu.memory_space<vmem>>, %arg7: memref<16x1xf32, #tpu.memory_space<vmem>>, %arg8: memref<8x128xf32, #tpu.memory_space<vmem>>, %arg9: memref<16x1xf32, #tpu.memory_space<vmem>>) attributes {dimension_semantics = [#tpu.dimension_semantics<parallel>], iteration_bounds = array<i64: 1>, scalar_prefetch = 0 : i64, scratch_operands = 0 : i64, tpu.core_type = #tpu.core_type<tc>, window_params = [{transform_indices = @transform_0, window_bounds = array<i64: 16, 24>}, {pipeline_mode = #tpu.pipeline_mode<synchronous>, transform_indices = @transform_1, window_bounds = array<i64: 16, 128>}, {pipeline_mode = #tpu.pipeline_mode<synchronous>, transform_indices = @transform_2, window_bounds = array<i64: 128, 64>}, {pipeline_mode = #tpu.pipeline_mode<synchronous>, transform_indices = @transform_3, window_bounds = array<i64: 8, 64>}, {pipeline_mode = #tpu.pipeline_mode<synchronous>, transform_indices = @transform_4, window_bounds = array<i64: 64, 32>}, {pipeline_mode = #tpu.pipeline_mode<synchronous>, transform_indices = @transform_5, window_bounds = array<i64: 32, 16>}, {pipeline_mode = #tpu.pipeline_mode<synchronous>, transform_indices = @transform_6, window_bounds = array<i64: 16, 1>}, {pipeline_mode = #tpu.pipeline_mode<synchronous>, transform_indices = @transform_7, window_bounds = array<i64: 8, 128>}, {transform_indices = @transform_8, window_bounds = array<i64: 16, 1>}]} {
    %c0 = arith.constant 0 : index
    %c0_0 = arith.constant 0 : index
    %0 = vector.load %arg2[%c0, %c0_0] : memref<16x128xf32, #tpu.memory_space<vmem>>, vector<16x128xf32>
    %c0_1 = arith.constant 0 : index
    %c0_2 = arith.constant 0 : index
    %1 = vector.load %arg3[%c0_1, %c0_2] : memref<128x64xf32, #tpu.memory_space<vmem>>, vector<128x64xf32>
    %c0_3 = arith.constant 0 : index
    %c0_4 = arith.constant 0 : index
    %2 = vector.load %arg4[%c0_3, %c0_4] : memref<8x64xf32, #tpu.memory_space<vmem>>, vector<8x64xf32>
    %c0_5 = arith.constant 0 : index
    %c0_6 = arith.constant 0 : index
    %3 = vector.load %arg5[%c0_5, %c0_6] : memref<64x32xf32, #tpu.memory_space<vmem>>, vector<64x32xf32>
    %c0_7 = arith.constant 0 : index
    %c0_8 = arith.constant 0 : index
    %4 = vector.load %arg6[%c0_7, %c0_8] : memref<32x16xf32, #tpu.memory_space<vmem>>, vector<32x16xf32>
    %c0_9 = arith.constant 0 : index
    %c0_10 = arith.constant 0 : index
    %5 = vector.load %arg7[%c0_9, %c0_10] : memref<16x1xf32, #tpu.memory_space<vmem>>, vector<16x1xf32>
    %c0_11 = arith.constant 0 : index
    %c0_12 = arith.constant 0 : index
    %6 = vector.load %arg8[%c0_11, %c0_12] : memref<8x128xf32, #tpu.memory_space<vmem>>, vector<1x128xf32>
    %c1 = arith.constant 1 : index
    %c0_13 = arith.constant 0 : index
    %7 = vector.load %arg8[%c1, %c0_13] : memref<8x128xf32, #tpu.memory_space<vmem>>, vector<1x64xf32>
    %c2 = arith.constant 2 : index
    %c0_14 = arith.constant 0 : index
    %8 = vector.load %arg8[%c2, %c0_14] : memref<8x128xf32, #tpu.memory_space<vmem>>, vector<1x32xf32>
    %c3 = arith.constant 3 : index
    %c0_15 = arith.constant 0 : index
    %9 = vector.load %arg8[%c3, %c0_15] : memref<8x128xf32, #tpu.memory_space<vmem>>, vector<1x16xf32>
    %c4 = arith.constant 4 : index
    %c0_16 = arith.constant 0 : index
    %10 = vector.load %arg8[%c4, %c0_16] : memref<8x128xf32, #tpu.memory_space<vmem>>, vector<1x1xf32>
    %c0_17 = arith.constant 0 : index
    %c0_18 = arith.constant 0 : index
    %11 = vector.load %arg1[%c0_17, %c0_18] : memref<16x24xf32, #tpu.memory_space<vmem>>, vector<16x24xf32>
    %12 = vector.extract_strided_slice %11 {offsets = [0, 0], sizes = [8, 24], strides = [1, 1]} : vector<16x24xf32> to vector<8x24xf32>
    %13 = vector.extract_strided_slice %12 {offsets = [0, 0], sizes = [8, 16], strides = [1, 1]} : vector<8x24xf32> to vector<8x16xf32>
    %14 = vector.extract_strided_slice %12 {offsets = [0, 16], sizes = [8, 8], strides = [1, 1]} : vector<8x24xf32> to vector<8x8xf32>
    %cst = arith.constant dense<0.000000e+00> : vector<8x128xf32>
    %15 = tpu.matmul %13, %0, %cst {dimension_numbers = #tpu.dot_dimension_numbers<[1], [0], [0], [1], [0, 0, 1, 1], [], []>} : vector<8x16xf32>, vector<16x128xf32>, vector<8x128xf32> -> vector<8x128xf32>
    %16 = vector.broadcast %6 : vector<1x128xf32> to vector<8x128xf32>
    %17 = arith.addf %15, %16 : vector<8x128xf32>
    %cst_19 = arith.constant 0.000000e+00 : f32
    %18 = vector.broadcast %cst_19 : f32 to vector<8x128xf32>
    %19 = arith.minimumf %17, %18 : vector<8x128xf32>
    %cst_20 = arith.constant 0.000000e+00 : f32
    %20 = vector.broadcast %cst_20 : f32 to vector<8x128xf32>
    %21 = arith.cmpf ogt, %17, %20 : vector<8x128xf32>
    %22 = math.exp %19 : vector<8x128xf32>
    %cst_21 = arith.constant 1.000000e+00 : f32
    %23 = vector.broadcast %cst_21 : f32 to vector<8x128xf32>
    %24 = arith.subf %22, %23 : vector<8x128xf32>
    %cst_22 = arith.constant 1.67326319 : f32
    %25 = vector.broadcast %cst_22 : f32 to vector<8x128xf32>
    %26 = arith.mulf %25, %24 : vector<8x128xf32>
    %27 = arith.select %21, %17, %26 : vector<8x128xi1>, vector<8x128xf32>
    %cst_23 = arith.constant 1.05070102 : f32
    %28 = vector.broadcast %cst_23 : f32 to vector<8x128xf32>
    %29 = arith.mulf %28, %27 : vector<8x128xf32>
    %cst_24 = arith.constant dense<0.000000e+00> : vector<8x64xf32>
    %30 = tpu.matmul %29, %1, %cst_24 {dimension_numbers = #tpu.dot_dimension_numbers<[1], [0], [0], [1], [0, 0, 1, 1], [], []>} : vector<8x128xf32>, vector<128x64xf32>, vector<8x64xf32> -> vector<8x64xf32>
    %cst_25 = arith.constant dense<0.000000e+00> : vector<8x64xf32>
    %31 = tpu.matmul %14, %2, %cst_25 {dimension_numbers = #tpu.dot_dimension_numbers<[1], [0], [0], [1], [0, 0, 1, 1], [], []>} : vector<8x8xf32>, vector<8x64xf32>, vector<8x64xf32> -> vector<8x64xf32>
    %32 = arith.addf %30, %31 : vector<8x64xf32>
    %33 = vector.broadcast %7 : vector<1x64xf32> to vector<8x64xf32>
    %34 = arith.addf %32, %33 : vector<8x64xf32>
    %cst_26 = arith.constant 0.000000e+00 : f32
    %35 = vector.broadcast %cst_26 : f32 to vector<8x64xf32>
    %36 = arith.minimumf %34, %35 : vector<8x64xf32>
    %cst_27 = arith.constant 0.000000e+00 : f32
    %37 = vector.broadcast %cst_27 : f32 to vector<8x64xf32>
    %38 = arith.cmpf ogt, %34, %37 : vector<8x64xf32>
    %39 = math.exp %36 : vector<8x64xf32>
    %cst_28 = arith.constant 1.000000e+00 : f32
    %40 = vector.broadcast %cst_28 : f32 to vector<8x64xf32>
    %41 = arith.subf %39, %40 : vector<8x64xf32>
    %cst_29 = arith.constant 1.67326319 : f32
    %42 = vector.broadcast %cst_29 : f32 to vector<8x64xf32>
    %43 = arith.mulf %42, %41 : vector<8x64xf32>
    %44 = arith.select %38, %34, %43 : vector<8x64xi1>, vector<8x64xf32>
    %cst_30 = arith.constant 1.05070102 : f32
    %45 = vector.broadcast %cst_30 : f32 to vector<8x64xf32>
    %46 = arith.mulf %45, %44 : vector<8x64xf32>
    %cst_31 = arith.constant dense<0.000000e+00> : vector<8x32xf32>
    %47 = tpu.matmul %46, %3, %cst_31 {dimension_numbers = #tpu.dot_dimension_numbers<[1], [0], [0], [1], [0, 0, 1, 1], [], []>} : vector<8x64xf32>, vector<64x32xf32>, vector<8x32xf32> -> vector<8x32xf32>
    %48 = vector.broadcast %8 : vector<1x32xf32> to vector<8x32xf32>
    %49 = arith.addf %47, %48 : vector<8x32xf32>
    %cst_32 = arith.constant 0.000000e+00 : f32
    %50 = vector.broadcast %cst_32 : f32 to vector<8x32xf32>
    %51 = arith.minimumf %49, %50 : vector<8x32xf32>
    %cst_33 = arith.constant 0.000000e+00 : f32
    %52 = vector.broadcast %cst_33 : f32 to vector<8x32xf32>
    %53 = arith.cmpf ogt, %49, %52 : vector<8x32xf32>
    %54 = math.exp %51 : vector<8x32xf32>
    %cst_34 = arith.constant 1.000000e+00 : f32
    %55 = vector.broadcast %cst_34 : f32 to vector<8x32xf32>
    %56 = arith.subf %54, %55 : vector<8x32xf32>
    %cst_35 = arith.constant 1.67326319 : f32
    %57 = vector.broadcast %cst_35 : f32 to vector<8x32xf32>
    %58 = arith.mulf %57, %56 : vector<8x32xf32>
    %59 = arith.select %53, %49, %58 : vector<8x32xi1>, vector<8x32xf32>
    %cst_36 = arith.constant 1.05070102 : f32
    %60 = vector.broadcast %cst_36 : f32 to vector<8x32xf32>
    %61 = arith.mulf %60, %59 : vector<8x32xf32>
    %cst_37 = arith.constant dense<0.000000e+00> : vector<8x16xf32>
    %62 = tpu.matmul %61, %4, %cst_37 {dimension_numbers = #tpu.dot_dimension_numbers<[1], [0], [0], [1], [0, 0, 1, 1], [], []>} : vector<8x32xf32>, vector<32x16xf32>, vector<8x16xf32> -> vector<8x16xf32>
    %63 = vector.broadcast %9 : vector<1x16xf32> to vector<8x16xf32>
    %64 = arith.addf %62, %63 : vector<8x16xf32>
    %cst_38 = arith.constant 0.000000e+00 : f32
    %65 = vector.broadcast %cst_38 : f32 to vector<8x16xf32>
    %66 = arith.minimumf %64, %65 : vector<8x16xf32>
    %cst_39 = arith.constant 0.000000e+00 : f32
    %67 = vector.broadcast %cst_39 : f32 to vector<8x16xf32>
    %68 = arith.cmpf ogt, %64, %67 : vector<8x16xf32>
    %69 = math.exp %66 : vector<8x16xf32>
    %cst_40 = arith.constant 1.000000e+00 : f32
    %70 = vector.broadcast %cst_40 : f32 to vector<8x16xf32>
    %71 = arith.subf %69, %70 : vector<8x16xf32>
    %cst_41 = arith.constant 1.67326319 : f32
    %72 = vector.broadcast %cst_41 : f32 to vector<8x16xf32>
    %73 = arith.mulf %72, %71 : vector<8x16xf32>
    %74 = arith.select %68, %64, %73 : vector<8x16xi1>, vector<8x16xf32>
    %cst_42 = arith.constant 1.05070102 : f32
    %75 = vector.broadcast %cst_42 : f32 to vector<8x16xf32>
    %76 = arith.mulf %75, %74 : vector<8x16xf32>
    %cst_43 = arith.constant dense<0.000000e+00> : vector<8x1xf32>
    %77 = tpu.matmul %76, %5, %cst_43 {dimension_numbers = #tpu.dot_dimension_numbers<[1], [0], [0], [1], [0, 0, 1, 1], [], []>} : vector<8x16xf32>, vector<16x1xf32>, vector<8x1xf32> -> vector<8x1xf32>
    %78 = vector.broadcast %10 : vector<1x1xf32> to vector<8x1xf32>
    %79 = arith.addf %77, %78 : vector<8x1xf32>
    %cst_44 = arith.constant 0.000000e+00 : f32
    %80 = vector.broadcast %cst_44 : f32 to vector<8x1xf32>
    %81 = arith.minimumf %79, %80 : vector<8x1xf32>
    %cst_45 = arith.constant 0.000000e+00 : f32
    %82 = vector.broadcast %cst_45 : f32 to vector<8x1xf32>
    %83 = arith.cmpf ogt, %79, %82 : vector<8x1xf32>
    %84 = math.exp %81 : vector<8x1xf32>
    %cst_46 = arith.constant 1.000000e+00 : f32
    %85 = vector.broadcast %cst_46 : f32 to vector<8x1xf32>
    %86 = arith.subf %84, %85 : vector<8x1xf32>
    %cst_47 = arith.constant 1.67326319 : f32
    %87 = vector.broadcast %cst_47 : f32 to vector<8x1xf32>
    %88 = arith.mulf %87, %86 : vector<8x1xf32>
    %89 = arith.select %83, %79, %88 : vector<8x1xi1>, vector<8x1xf32>
    %cst_48 = arith.constant 1.05070102 : f32
    %90 = vector.broadcast %cst_48 : f32 to vector<8x1xf32>
    %91 = arith.mulf %90, %89 : vector<8x1xf32>
    %c0_49 = arith.constant 0 : index
    %c0_50 = arith.constant 0 : index
    %92 = vector.load %arg9[%c0_49, %c0_50] : memref<16x1xf32, #tpu.memory_space<vmem>>, vector<8x1xf32>
    tpu.vector_store %arg9[%c0_49, %c0_50], %91 {strides = array<i32>} : memref<16x1xf32, #tpu.memory_space<vmem>>, vector<8x1xf32>,
    %93 = vector.extract_strided_slice %11 {offsets = [8, 0], sizes = [8, 24], strides = [1, 1]} : vector<16x24xf32> to vector<8x24xf32>
    %94 = vector.extract_strided_slice %93 {offsets = [0, 0], sizes = [8, 16], strides = [1, 1]} : vector<8x24xf32> to vector<8x16xf32>
    %95 = vector.extract_strided_slice %93 {offsets = [0, 16], sizes = [8, 8], strides = [1, 1]} : vector<8x24xf32> to vector<8x8xf32>
    %cst_51 = arith.constant dense<0.000000e+00> : vector<8x128xf32>
    %96 = tpu.matmul %94, %0, %cst_51 {dimension_numbers = #tpu.dot_dimension_numbers<[1], [0], [0], [1], [0, 0, 1, 1], [], []>} : vector<8x16xf32>, vector<16x128xf32>, vector<8x128xf32> -> vector<8x128xf32>
    %97 = vector.broadcast %6 : vector<1x128xf32> to vector<8x128xf32>
    %98 = arith.addf %96, %97 : vector<8x128xf32>
    %cst_52 = arith.constant 0.000000e+00 : f32
    %99 = vector.broadcast %cst_52 : f32 to vector<8x128xf32>
    %100 = arith.minimumf %98, %99 : vector<8x128xf32>
    %cst_53 = arith.constant 0.000000e+00 : f32
    %101 = vector.broadcast %cst_53 : f32 to vector<8x128xf32>
    %102 = arith.cmpf ogt, %98, %101 : vector<8x128xf32>
    %103 = math.exp %100 : vector<8x128xf32>
    %cst_54 = arith.constant 1.000000e+00 : f32
    %104 = vector.broadcast %cst_54 : f32 to vector<8x128xf32>
    %105 = arith.subf %103, %104 : vector<8x128xf32>
    %cst_55 = arith.constant 1.67326319 : f32
    %106 = vector.broadcast %cst_55 : f32 to vector<8x128xf32>
    %107 = arith.mulf %106, %105 : vector<8x128xf32>
    %108 = arith.select %102, %98, %107 : vector<8x128xi1>, vector<8x128xf32>
    %cst_56 = arith.constant 1.05070102 : f32
    %109 = vector.broadcast %cst_56 : f32 to vector<8x128xf32>
    %110 = arith.mulf %109, %108 : vector<8x128xf32>
    %cst_57 = arith.constant dense<0.000000e+00> : vector<8x64xf32>
    %111 = tpu.matmul %110, %1, %cst_57 {dimension_numbers = #tpu.dot_dimension_numbers<[1], [0], [0], [1], [0, 0, 1, 1], [], []>} : vector<8x128xf32>, vector<128x64xf32>, vector<8x64xf32> -> vector<8x64xf32>
    %cst_58 = arith.constant dense<0.000000e+00> : vector<8x64xf32>
    %112 = tpu.matmul %95, %2, %cst_58 {dimension_numbers = #tpu.dot_dimension_numbers<[1], [0], [0], [1], [0, 0, 1, 1], [], []>} : vector<8x8xf32>, vector<8x64xf32>, vector<8x64xf32> -> vector<8x64xf32>
    %113 = arith.addf %111, %112 : vector<8x64xf32>
    %114 = vector.broadcast %7 : vector<1x64xf32> to vector<8x64xf32>
    %115 = arith.addf %113, %114 : vector<8x64xf32>
    %cst_59 = arith.constant 0.000000e+00 : f32
    %116 = vector.broadcast %cst_59 : f32 to vector<8x64xf32>
    %117 = arith.minimumf %115, %116 : vector<8x64xf32>
    %cst_60 = arith.constant 0.000000e+00 : f32
    %118 = vector.broadcast %cst_60 : f32 to vector<8x64xf32>
    %119 = arith.cmpf ogt, %115, %118 : vector<8x64xf32>
    %120 = math.exp %117 : vector<8x64xf32>
    %cst_61 = arith.constant 1.000000e+00 : f32
    %121 = vector.broadcast %cst_61 : f32 to vector<8x64xf32>
    %122 = arith.subf %120, %121 : vector<8x64xf32>
    %cst_62 = arith.constant 1.67326319 : f32
    %123 = vector.broadcast %cst_62 : f32 to vector<8x64xf32>
    %124 = arith.mulf %123, %122 : vector<8x64xf32>
    %125 = arith.select %119, %115, %124 : vector<8x64xi1>, vector<8x64xf32>
    %cst_63 = arith.constant 1.05070102 : f32
    %126 = vector.broadcast %cst_63 : f32 to vector<8x64xf32>
    %127 = arith.mulf %126, %125 : vector<8x64xf32>
    %cst_64 = arith.constant dense<0.000000e+00> : vector<8x32xf32>
    %128 = tpu.matmul %127, %3, %cst_64 {dimension_numbers = #tpu.dot_dimension_numbers<[1], [0], [0], [1], [0, 0, 1, 1], [], []>} : vector<8x64xf32>, vector<64x32xf32>, vector<8x32xf32> -> vector<8x32xf32>
    %129 = vector.broadcast %8 : vector<1x32xf32> to vector<8x32xf32>
    %130 = arith.addf %128, %129 : vector<8x32xf32>
    %cst_65 = arith.constant 0.000000e+00 : f32
    %131 = vector.broadcast %cst_65 : f32 to vector<8x32xf32>
    %132 = arith.minimumf %130, %131 : vector<8x32xf32>
    %cst_66 = arith.constant 0.000000e+00 : f32
    %133 = vector.broadcast %cst_66 : f32 to vector<8x32xf32>
    %134 = arith.cmpf ogt, %130, %133 : vector<8x32xf32>
    %135 = math.exp %132 : vector<8x32xf32>
    %cst_67 = arith.constant 1.000000e+00 : f32
    %136 = vector.broadcast %cst_67 : f32 to vector<8x32xf32>
    %137 = arith.subf %135, %136 : vector<8x32xf32>
    %cst_68 = arith.constant 1.67326319 : f32
    %138 = vector.broadcast %cst_68 : f32 to vector<8x32xf32>
    %139 = arith.mulf %138, %137 : vector<8x32xf32>
    %140 = arith.select %134, %130, %139 : vector<8x32xi1>, vector<8x32xf32>
    %cst_69 = arith.constant 1.05070102 : f32
    %141 = vector.broadcast %cst_69 : f32 to vector<8x32xf32>
    %142 = arith.mulf %141, %140 : vector<8x32xf32>
    %cst_70 = arith.constant dense<0.000000e+00> : vector<8x16xf32>
    %143 = tpu.matmul %142, %4, %cst_70 {dimension_numbers = #tpu.dot_dimension_numbers<[1], [0], [0], [1], [0, 0, 1, 1], [], []>} : vector<8x32xf32>, vector<32x16xf32>, vector<8x16xf32> -> vector<8x16xf32>
    %144 = vector.broadcast %9 : vector<1x16xf32> to vector<8x16xf32>
    %145 = arith.addf %143, %144 : vector<8x16xf32>
    %cst_71 = arith.constant 0.000000e+00 : f32
    %146 = vector.broadcast %cst_71 : f32 to vector<8x16xf32>
    %147 = arith.minimumf %145, %146 : vector<8x16xf32>
    %cst_72 = arith.constant 0.000000e+00 : f32
    %148 = vector.broadcast %cst_72 : f32 to vector<8x16xf32>
    %149 = arith.cmpf ogt, %145, %148 : vector<8x16xf32>
    %150 = math.exp %147 : vector<8x16xf32>
    %cst_73 = arith.constant 1.000000e+00 : f32
    %151 = vector.broadcast %cst_73 : f32 to vector<8x16xf32>
    %152 = arith.subf %150, %151 : vector<8x16xf32>
    %cst_74 = arith.constant 1.67326319 : f32
    %153 = vector.broadcast %cst_74 : f32 to vector<8x16xf32>
    %154 = arith.mulf %153, %152 : vector<8x16xf32>
    %155 = arith.select %149, %145, %154 : vector<8x16xi1>, vector<8x16xf32>
    %cst_75 = arith.constant 1.05070102 : f32
    %156 = vector.broadcast %cst_75 : f32 to vector<8x16xf32>
    %157 = arith.mulf %156, %155 : vector<8x16xf32>
    %cst_76 = arith.constant dense<0.000000e+00> : vector<8x1xf32>
    %158 = tpu.matmul %157, %5, %cst_76 {dimension_numbers = #tpu.dot_dimension_numbers<[1], [0], [0], [1], [0, 0, 1, 1], [], []>} : vector<8x16xf32>, vector<16x1xf32>, vector<8x1xf32> -> vector<8x1xf32>
    %159 = vector.broadcast %10 : vector<1x1xf32> to vector<8x1xf32>
    %160 = arith.addf %158, %159 : vector<8x1xf32>
    %cst_77 = arith.constant 0.000000e+00 : f32
    %161 = vector.broadcast %cst_77 : f32 to vector<8x1xf32>
    %162 = arith.minimumf %160, %161 : vector<8x1xf32>
    %cst_78 = arith.constant 0.000000e+00 : f32
    %163 = vector.broadcast %cst_78 : f32 to vector<8x1xf32>
    %164 = arith.cmpf ogt, %160, %163 : vector<8x1xf32>
    %165 = math.exp %162 : vector<8x1xf32>
    %cst_79 = arith.constant 1.000000e+00 : f32
    %166 = vector.broadcast %cst_79 : f32 to vector<8x1xf32>
    %167 = arith.subf %165, %166 : vector<8x1xf32>
    %cst_80 = arith.constant 1.67326319 : f32
    %168 = vector.broadcast %cst_80 : f32 to vector<8x1xf32>
    %169 = arith.mulf %168, %167 : vector<8x1xf32>
    %170 = arith.select %164, %160, %169 : vector<8x1xi1>, vector<8x1xf32>
    %cst_81 = arith.constant 1.05070102 : f32
    %171 = vector.broadcast %cst_81 : f32 to vector<8x1xf32>
    %172 = arith.mulf %171, %170 : vector<8x1xf32>
    %c8 = arith.constant 8 : index
    %c0_82 = arith.constant 0 : index
    %173 = vector.load %arg9[%c8, %c0_82] : memref<16x1xf32, #tpu.memory_space<vmem>>, vector<8x1xf32>
    tpu.vector_store %arg9[%c8, %c0_82], %172 {strides = array<i32>} : memref<16x1xf32, #tpu.memory_space<vmem>>, vector<8x1xf32>,
    return
  }
  func.func @transform_0(%arg0: i32) -> (i32, i32) {
    %c0_i32 = arith.constant 0 : i32
    %c0_i32_0 = arith.constant 0 : i32
    return %arg0, %c0_i32 : i32, i32
  }
  func.func @transform_1(%arg0: i32) -> (i32, i32) {
    %c0_i32 = arith.constant 0 : i32
    %c0_i32_0 = arith.constant 0 : i32
    %c0_i32_1 = arith.constant 0 : i32
    return %c0_i32, %c0_i32_0 : i32, i32
  }
  func.func @transform_2(%arg0: i32) -> (i32, i32) {
    %c0_i32 = arith.constant 0 : i32
    %c0_i32_0 = arith.constant 0 : i32
    %c0_i32_1 = arith.constant 0 : i32
    return %c0_i32, %c0_i32_0 : i32, i32
  }
  func.func @transform_3(%arg0: i32) -> (i32, i32) {
    %c0_i32 = arith.constant 0 : i32
    %c0_i32_0 = arith.constant 0 : i32
    %c0_i32_1 = arith.constant 0 : i32
    return %c0_i32, %c0_i32_0 : i32, i32
  }
  func.func @transform_4(%arg0: i32) -> (i32, i32) {
    %c0_i32 = arith.constant 0 : i32
    %c0_i32_0 = arith.constant 0 : i32
    %c0_i32_1 = arith.constant 0 : i32
    return %c0_i32, %c0_i32_0 : i32, i32
  }
  func.func @transform_5(%arg0: i32) -> (i32, i32) {
    %c0_i32 = arith.constant 0 : i32
    %c0_i32_0 = arith.constant 0 : i32
    %c0_i32_1 = arith.constant 0 : i32
    return %c0_i32, %c0_i32_0 : i32, i32
  }
  func.func @transform_6(%arg0: i32) -> (i32, i32) {
    %c0_i32 = arith.constant 0 : i32
    %c0_i32_0 = arith.constant 0 : i32
    %c0_i32_1 = arith.constant 0 : i32
    return %c0_i32, %c0_i32_0 : i32, i32
  }
  func.func @transform_7(%arg0: i32) -> (i32, i32) {
    %c0_i32 = arith.constant 0 : i32
    %c0_i32_0 = arith.constant 0 : i32
    %c0_i32_1 = arith.constant 0 : i32
    return %c0_i32, %c0_i32_0 : i32, i32
  }
  func.func @transform_8(%arg0: i32) -> (i32, i32) {
    %c0_i32 = arith.constant 0 : i32
    %c0_i32_0 = arith.constant 0 : i32
    return %arg0, %c0_i32 : i32, i32
  }
}

</mosaic_0001>

<bundles_post_ra>
// kernel: critic_forward.1
= control target key start
LH: loop header
LB: loop body
LE: loop exit
PB: predicated region body
PF: predicated region fallthrough
CT: control target
= control target key end

     0   :  { %v1348_v0 = vmov 0.0   ;;  %vm1349_vm0 = vmmov 0   ;;  %vm73_vm1 = vcmask 130048   ;;  %s1350_s11 = smov 112   ;;  %vm157_vm2 = vcmask 64512   ;;  %s1780_s1 = inlined_call_operand.vmem [shape: f32[16,128], index: 1, kind: input, shape index: {}]   ;;  %s1781_s0 = inlined_call_operand.vmem [shape: f32[16,24], index: 0, kind: input, shape index: {}]   ;;  %s1782_s3 = inlined_call_operand.vmem [shape: f32[8,64], index: 3, kind: input, shape index: {}]   ;;  %s1783_s2 = inlined_call_operand.vmem [shape: f32[128,64], index: 2, kind: input, shape index: {}]   ;;  %s1784_s7 = inlined_call_operand.vmem [shape: f32[8,128], index: 7, kind: input, shape index: {}]   ;;  %s1785_s4 = inlined_call_operand.vmem [shape: f32[64,32], index: 4, kind: input, shape index: {}]   ;;  %s1786_s5 = inlined_call_operand.vmem [shape: f32[32,16], index: 5, kind: input, shape index: {}]   ;;  %s1787_s6 = inlined_call_operand.vmem [shape: f32[16,1], index: 6, kind: input, shape index: {}]   ;;  %s1788_s8 = inlined_call_operand.vmem [shape: f32[16,1], index: 8, kind: output, shape index: {}]  }
   0x1   :  { %1157 = vmatprep.subr.mxu0 %v1348_v0  ;;  %v1400_v1 = vld [vmem:[%s1780_s1 + $0x8] sm:$0xff]  ;;  %v1405_v2 = vld [vmem:[%s1780_s1] sm:$0xff]  ;;  %1161 = vmatprep.mubr.msk.f32.mxu0 %vm1349_vm0, %v1348_v0  ;;  %v1438_v6 = vld [vmem:[%s1783_s2 + $0x78] sm:$0xff]  ;;  %vm317_vm5 = vcmask 523264   ;;  %vm403_vm7 = vcmask 261120   ;;  %vm570_vm10 = vcmask 7168  }
   0x2   :  { %v67_v3 = vld [vmem:[%s1781_s0] sm:$0xff]  ;;  %1158 = vmatpush3.msra.mxu0 %v1400_v1  ;;  %1164 = vmatprep.subr.mxu1 %v1348_v0  ;;  %v1428_v5 = vld [vmem:[%s1781_s0 + $0x8] sm:$0xff]  ;;  %v1444_v8 = vld [vmem:[%s1783_s2 + $0x70] sm:$0xff] }
   0x3   :  { %155 = vrot.lane.b32.xlu0 %v67_v3, %s1350_s11  ;;  %v1416_v4 = vld [vmem:[%s1782_s3] sm:$0xff]  ;;  %1159 = vmatprep.subr.mxu0 %v1348_v0  ;;  %v1453_v9 = vld [vmem:[%s1783_s2 + $0x68] sm:$0xff]  ;;  %v1467_v11 = vld [vmem:[%s1783_s2 + $0x58] sm:$0xff] }
   0x4   :  { %1160 = vmatpush3.msra.mxu0 %v1405_v2  ;;  %1165 = vmatpush3.msra.mxu1 %v1416_v4  ;;  %v1460_v10 = vld [vmem:[%s1783_s2 + $0x60] sm:$0xff]  ;;  %v1474_v12 = vld [vmem:[%s1783_s2 + $0x50] sm:$0xff]  ;;  %v1481_v13 = vld [vmem:[%s1783_s2 + $0x48] sm:$0xff] }
   0x5   :  { %1162 = vmatmul.mubr.msk.f32.vlgmr.msra.gmra.mxu0 %vm73_vm1, %v67_v3  ;;  %1166 = vmatprep.mubr.msk.f32.mxu1 %vm1349_vm0, %v1348_v0  ;;  %v1488_v14 = vld [vmem:[%s1783_s2 + $0x40] sm:$0xff]  ;;  %v1495_v15 = vld [vmem:[%s1783_s2 + $0x38] sm:$0xff]  ;;  %v1502_v16 = vld [vmem:[%s1783_s2 + $0x30] sm:$0xff] }
   0x6   :  { %1169 = vmatprep.subr.mxu1 %v1348_v0  ;;  %1204 = vmatprep.subr.mxu0 %v1348_v0  ;;  %v1509_v17 = vld [vmem:[%s1783_s2 + $0x28] sm:$0xff]  ;;  %v1516_v18 = vld [vmem:[%s1783_s2 + $0x20] sm:$0xff]  ;;  %v1523_v19 = vld [vmem:[%s1783_s2 + $0x18] sm:$0xff] }
   0x7   :  { %1220 = vmatprep.mubr.msk.f32.mxu0 %vm1349_vm0, %v1348_v0  ;;  %653 = vrot.lane.b32.xlu0 %v1428_v5, %s1350_s11  ;;  %v1530_v20 = vld [vmem:[%s1783_s2 + $0x10] sm:$0xff]  ;;  %v1537_v21 = vld [vmem:[%s1783_s2 + $0x8] sm:$0xff]  ;;  %v1544_v22 = vld [vmem:[%s1783_s2] sm:$0xff] }
   0x8   :  { %v1553_v23 = vld [vmem:[%s1784_s7] ss:$0 sm:$0xff]  ;;  %v1563_v34 = vld [vmem:[%s1785_s4 + $0x38] sm:$0xff]  ;;  %v1570_v35 = vld [vmem:[%s1785_s4 + $0x30] sm:$0xff] }
   0x9   :  { %1205 = vmatpush3.msra.mxu0 %v1563_v34  ;;  %v1577_v36 = vld [vmem:[%s1785_s4 + $0x28] sm:$0xff]  ;;  %v1584_v38 = vld [vmem:[%s1785_s4 + $0x20] sm:$0xff]  ;;  %v1591_v40 = vld [vmem:[%s1785_s4 + $0x18] sm:$0xff] }
   0xa   :  { %1206 = vmatprep.subr.mxu0 %v1348_v0  ;;  %v1598_v41 = vld [vmem:[%s1785_s4 + $0x10] sm:$0xff]  ;;  %v1605_v42 = vld [vmem:[%s1785_s4 + $0x8] sm:$0xff]  ;;  %v1612_v43 = vld [vmem:[%s1785_s4] sm:$0xff] }
   0xb   :  { %1207 = vmatpush3.msra.mxu0 %v1570_v35  ;;  %v1619_v44 = vld [vmem:[%s1784_s7 + $0x1] ss:$0 sm:$0xff]  ;;  %v1628_v56 = vld [vmem:[%s1786_s5 + $0x18] sm:$0xff]  ;;  %v1635_v57 = vld [vmem:[%s1786_s5 + $0x10] sm:$0xff] }
   0xc   :  { %1208 = vmatprep.subr.mxu0 %v1348_v0  ;;  %v1642_v58 = vld [vmem:[%s1786_s5 + $0x8] sm:$0xff]  ;;  %v1649_v59 = vld [vmem:[%s1786_s5] sm:$0xff] }
   0xd   :  { %1209 = vmatpush3.msra.mxu0 %v1577_v36  ;;  %v1656_v60 = vld [vmem:[%s1784_s7 + $0x2] ss:$0 sm:$0xff] }
   0xe   :  { %1210 = vmatprep.subr.mxu0 %v1348_v0 }
   0xf   :  { %1211 = vmatpush3.msra.mxu0 %v1584_v38 }
  0x10   :  { %1212 = vmatprep.subr.mxu0 %v1348_v0 }
  0x11   :  { %1213 = vmatpush3.msra.mxu0 %v1591_v40 }
  0x12   :  { %1214 = vmatprep.subr.mxu0 %v1348_v0 }
  0x13   :  { %1215 = vmatpush3.msra.mxu0 %v1598_v41 }
  0x14   :  { %1216 = vmatprep.subr.mxu0 %v1348_v0 }
  0x15   :  { %1217 = vmatpush3.msra.mxu0 %v1605_v42 }
  0x16   :  { %1218 = vmatprep.subr.mxu0 %v1348_v0 }
  0x17   :  { %1219 = vmatpush3.msra.mxu0 %v1612_v43 }
  0x18   :  { %1223 = vmatprep.subr.mxu0 %v1348_v0 }
  0x75   :  { %v156_v7 = vpop.permute.xlu0 %155 }
  0x76   :  { %1167 = vmatmul.mubr.msk.f32.vlgmr.msra.gmra.mxu1 %vm157_vm2, %v156_v7 }
  0x77   :  { %1170 = vmatpush3.msra.mxu1 %v1438_v6  ;;  %1201 = vmatprep.mubr.msk.f32.mxu1 %vm1349_vm0, %v1348_v0 }
  0x78   :  { %1171 = vmatprep.subr.mxu1 %v1348_v0 }
  0x79   :  { %1172 = vmatpush3.msra.mxu1 %v1444_v8 }
  0x7a   :  { %1173 = vmatprep.subr.mxu1 %v1348_v0 }
  0x7b   :  { %1174 = vmatpush3.msra.mxu1 %v1453_v9 }
  0x7c   :  { %1175 = vmatprep.subr.mxu1 %v1348_v0 }
  0x7d   :  { %1176 = vmatpush3.msra.mxu1 %v1460_v10 }
  0x7e   :  { %1177 = vmatprep.subr.mxu1 %v1348_v0 }
  0x7f   :  { %1178 = vmatpush3.msra.mxu1 %v1467_v11 }
  0x80   :  { %1179 = vmatprep.subr.mxu1 %v1348_v0 }
  0x81   :  { %1180 = vmatpush3.msra.mxu1 %v1474_v12 }
  0x82   :  { %1181 = vmatprep.subr.mxu1 %v1348_v0 }
  0x83   :  { %1182 = vmatpush3.msra.mxu1 %v1481_v13 }
  0x84   :  { %1183 = vmatprep.subr.mxu1 %v1348_v0 }
  0x85   :  { %1184 = vmatpush3.msra.mxu1 %v1488_v14 }
  0x86   :  { %1185 = vmatprep.subr.mxu1 %v1348_v0 }
  0x87   :  { %1186 = vmatpush3.msra.mxu1 %v1495_v15 }
  0x88   :  { %1187 = vmatprep.subr.mxu1 %v1348_v0 }
  0x89   :  { %1188 = vmatpush3.msra.mxu1 %v1502_v16 }
  0x8a   :  { %1189 = vmatprep.subr.mxu1 %v1348_v0 }
  0x8b   :  { %1190 = vmatpush3.msra.mxu1 %v1509_v17 }
  0x8c   :  { %1191 = vmatprep.subr.mxu1 %v1348_v0 }
  0x8d   :  { %1192 = vmatpush3.msra.mxu1 %v1516_v18 }
  0x8e   :  { %1193 = vmatprep.subr.mxu1 %v1348_v0 }
  0x8f   :  { %1194 = vmatpush3.msra.mxu1 %v1523_v19 }
  0x90   :  { %1195 = vmatprep.subr.mxu1 %v1348_v0 }
  0x91   :  { %1196 = vmatpush3.msra.mxu1 %v1530_v20 }
  0x92   :  { %1197 = vmatprep.subr.mxu1 %v1348_v0 }
  0x93   :  { %1198 = vmatpush3.msra.mxu1 %v1537_v21 }
  0x94   :  { %1199 = vmatprep.subr.mxu1 %v1348_v0 }
  0x95   :  { %1200 = vmatpush3.msra.mxu1 %v1544_v22 }
  0x96   :  { %1248 = vmatprep.subr.mxu1 %v1348_v0 }
  0xc5   :  { %v143_v24 = vpop.f32.mrf.mxu0 }
  0xc6   :  { %v144_v25 = vadd.f32 %v1553_v23, %v143_v24 }
  0xc7   :  { %v1163_v26 = vpop.f32.mrf.mxu0 }
  0xc8   :  { %v147_v27 = vmin.f32 %v144_v25, 0.0  ;;  %vm148_vm3 = vcmp.gt.f32.partialorder %v144_v25, 0.0 }
  0xca   :  { %v149_v28 = vmul.f32 1.442695, %v147_v27 }
  0xcc   :  { %1328 = vpow2.f32 %v149_v28  ;;  %v1665_v28 = vld [vmem:[%s1787_s6 + $0x8] sm:$0xff] }
  0xd9   :  { %v1329_v29 = vpop.eup %1328 }
  0xda   :  { %v1056_v30 = vadd.f32 -1.0, %v1329_v29  ;;  %v1672_v29 = vld [vmem:[%s1787_s6] sm:$0xff] }
  0xdc   :  { %v152_v31 = vmul.f32 1.6732632, %v1056_v30  ;;  %v1679_v30 = vld [vmem:[%s1784_s7 + $0x3] ss:$0 sm:$0xff] }
  0xde   :  { %v153_v32 = vsel %vm148_vm3, %v144_v25, %v152_v31 }
  0xdf   :  { %v154_v33 = vmul.f32 1.050701, %v153_v32 }
  0xe1   :  { %1202 = vmatmul.mubr.f32.vlgmr.msra.gmra.mxu1 %v154_v33 }
  0xe2   :  { %1249 = vmatpush3.msra.mxu1 %v1416_v4  ;;  %1250 = vmatprep.mubr.msk.f32.mxu1 %vm1349_vm0, %v1348_v0 }
  0xe3   :  { %1288 = vmatprep.subr.mxu1 %v1348_v0 }
 0x136   :  { %v226_v37 = vpop.f32.mrf.mxu1 }
 0x138   :  { %v1168_v39 = vpop.f32.mrf.mxu1 }
 0x1a1   :  { %v296_v45 = vpop.f32.mrf.mxu1 }
 0x1a2   :  { %v297_v46 = vadd.f32 %v296_v45, %v226_v37 }
 0x1a3   :  { %v1203_v47 = vpop.f32.mrf.mxu1 }
 0x1a4   :  { %v304_v48 = vadd.f32 %v1619_v44, %v297_v46 }
 0x1a6   :  { %v305_v49 = vmin.f32 %v304_v48, 0.0  ;;  %vm306_vm4 = vcmp.gt.f32.partialorder %v304_v48, 0.0 }
 0x1a8   :  { %v307_v50 = vmul.f32 1.442695, %v305_v49 }
 0x1aa   :  { %1330 = vpow2.f32 %v307_v50 }
 0x1b7   :  { %v1331_v51 = vpop.eup %1330 }
 0x1b8   :  { %v1059_v52 = vadd.f32 -1.0, %v1331_v51 }
 0x1ba   :  { %v310_v53 = vmul.f32 1.6732632, %v1059_v52 }
 0x1bc   :  { %v311_v54 = vsel %vm306_vm4, %v304_v48, %v310_v53 }
 0x1bd   :  { %v312_v55 = vmul.f32 1.050701, %v311_v54 }
 0x1bf   :  { %1221 = vmatmul.mubr.msk.f32.vlgmr.msra.gmra.mxu0 %vm317_vm5, %v312_v55 }
 0x1c0   :  { %1231 = vmatprep.mubr.msk.f32.mxu0 %vm1349_vm0, %v1348_v0  ;;  %1224 = vmatpush3.msra.mxu0 %v1628_v56 }
 0x1c1   :  { %1225 = vmatprep.subr.mxu0 %v1348_v0 }
 0x1c2   :  { %1226 = vmatpush3.msra.mxu0 %v1635_v57 }
 0x1c3   :  { %1227 = vmatprep.subr.mxu0 %v1348_v0 }
 0x1c4   :  { %1228 = vmatpush3.msra.mxu0 %v1642_v58 }
 0x1c5   :  { %1229 = vmatprep.subr.mxu0 %v1348_v0 }
 0x1c6   :  { %1230 = vmatpush3.msra.mxu0 %v1649_v59 }
 0x1c7   :  { %1234 = vmatprep.subr.mxu0 %v1348_v0 }
 0x27f   :  { %v387_v61 = vpop.f32.mrf.mxu0 }
 0x280   :  { %v388_v62 = vadd.f32 %v1656_v60, %v387_v61 }
 0x281   :  { %v1222_v63 = vpop.f32.mrf.mxu0 }
 0x282   :  { %v391_v3 = vmin.f32 %v388_v62, 0.0  ;;  %vm392_vm6 = vcmp.gt.f32.partialorder %v388_v62, 0.0 }
 0x284   :  { %v393_v4 = vmul.f32 1.442695, %v391_v3 }
 0x286   :  { %1332 = vpow2.f32 %v393_v4 }
 0x293   :  { %v1333_v7 = vpop.eup %1332 }
 0x294   :  { %v1062_v24 = vadd.f32 -1.0, %v1333_v7 }
 0x296   :  { %v396_v25 = vmul.f32 1.6732632, %v1062_v24 }
 0x298   :  { %v397_v26 = vsel %vm392_vm6, %v388_v62, %v396_v25 }
 0x299   :  { %v398_v27 = vmul.f32 1.050701, %v397_v26 }
 0x29b   :  { %1232 = vmatmul.mubr.msk.f32.vlgmr.msra.gmra.mxu0 %vm403_vm7, %v398_v27 }
 0x29c   :  { %1238 = vmatprep.mubr.msk.f32.mxu0 %vm1349_vm0, %v1348_v0  ;;  %1235 = vmatpush3.msra.mxu0 %v1665_v28 }
 0x29d   :  { %1236 = vmatprep.subr.mxu0 %v1348_v0 }
 0x29e   :  { %1237 = vmatpush3.msra.mxu0 %v1672_v29 }
 0x29f   :  { %1241 = vmatprep.subr.mxu0 %v1348_v0 }
 0x35b   :  { %v473_v31 = vpop.f32.mrf.mxu0 }
 0x35c   :  { %v474_v32 = vadd.f32 %v1679_v30, %v473_v31 }
 0x35d   :  { %v1233_v33 = vpop.f32.mrf.mxu0 }
 0x35e   :  { %v477_v37 = vmin.f32 %v474_v32, 0.0  ;;  %vm478_vm8 = vcmp.gt.f32.partialorder %v474_v32, 0.0 }
 0x360   :  { %v479_v39 = vmul.f32 1.442695, %v477_v37 }
 0x362   :  { %1334 = vpow2.f32 %v479_v39 }
 0x36f   :  { %v1335_v45 = vpop.eup %1334 }
 0x370   :  { %v1065_v46 = vadd.f32 -1.0, %v1335_v45 }
 0x372   :  { %v482_v47 = vmul.f32 1.6732632, %v1065_v46 }
 0x374   :  { %v483_v48 = vsel %vm478_vm8, %v474_v32, %v482_v47 }
 0x375   :  { %v484_v49 = vmul.f32 1.050701, %v483_v48 }
 0x377   :  { %1239 = vmatmul.mubr.msk.f32.vlgmr.msra.gmra.mxu0 %vm73_vm1, %v484_v49 }
 0x378   :  { %1242 = vmatpush3.msra.mxu0 %v1400_v1  ;;  %1245 = vmatprep.mubr.msk.f32.mxu0 %vm1349_vm0, %v1348_v0  ;;  %v654_v1 = vpop.permute.xlu0 %653 }
 0x379   :  { %1243 = vmatprep.subr.mxu0 %v1348_v0  ;;  %1251 = vmatmul.mubr.msk.f32.vlgmr.msra.gmra.mxu1 %vm157_vm2, %v654_v1 }
 0x37a   :  { %1244 = vmatpush3.msra.mxu0 %v1405_v2  ;;  %1289 = vmatpush3.msra.mxu1 %v1563_v34  ;;  %v1746_v2 = vld [vmem:[%s1784_s7 + $0x4] ss:$0 sm:$0xff] }
 0x37b   :  { %1246 = vmatmul.mubr.msk.f32.vlgmr.msra.gmra.mxu0 %vm73_vm1, %v1428_v5  ;;  %1253 = vmatprep.subr.mxu0 %v1348_v0 }
 0x37c   :  { %1254 = vmatpush3.msra.mxu0 %v1438_v6  ;;  %1285 = vmatprep.mubr.msk.f32.mxu0 %vm1349_vm0, %v1348_v0 }
 0x37d   :  { %1255 = vmatprep.subr.mxu0 %v1348_v0  ;;  %1304 = vmatprep.mubr.msk.f32.mxu1 %vm1349_vm0, %v1348_v0 }
 0x37e   :  { %1256 = vmatpush3.msra.mxu0 %v1444_v8  ;;  %1290 = vmatprep.subr.mxu1 %v1348_v0 }
 0x37f   :  { %1257 = vmatprep.subr.mxu0 %v1348_v0  ;;  %1291 = vmatpush3.msra.mxu1 %v1570_v35 }
 0x380   :  { %1258 = vmatpush3.msra.mxu0 %v1453_v9  ;;  %1292 = vmatprep.subr.mxu1 %v1348_v0 }
 0x381   :  { %1259 = vmatprep.subr.mxu0 %v1348_v0  ;;  %1293 = vmatpush3.msra.mxu1 %v1577_v36 }
 0x382   :  { %1260 = vmatpush3.msra.mxu0 %v1460_v10  ;;  %1294 = vmatprep.subr.mxu1 %v1348_v0 }
 0x383   :  { %1261 = vmatprep.subr.mxu0 %v1348_v0  ;;  %1295 = vmatpush3.msra.mxu1 %v1584_v38 }
 0x384   :  { %1262 = vmatpush3.msra.mxu0 %v1467_v11  ;;  %1296 = vmatprep.subr.mxu1 %v1348_v0 }
 0x385   :  { %1263 = vmatprep.subr.mxu0 %v1348_v0  ;;  %1297 = vmatpush3.msra.mxu1 %v1591_v40 }
 0x386   :  { %1264 = vmatpush3.msra.mxu0 %v1474_v12  ;;  %1298 = vmatprep.subr.mxu1 %v1348_v0 }
 0x387   :  { %1265 = vmatprep.subr.mxu0 %v1348_v0  ;;  %1299 = vmatpush3.msra.mxu1 %v1598_v41 }
 0x388   :  { %1266 = vmatpush3.msra.mxu0 %v1481_v13  ;;  %1300 = vmatprep.subr.mxu1 %v1348_v0 }
 0x389   :  { %1267 = vmatprep.subr.mxu0 %v1348_v0  ;;  %1301 = vmatpush3.msra.mxu1 %v1605_v42 }
 0x38a   :  { %1268 = vmatpush3.msra.mxu0 %v1488_v14  ;;  %1302 = vmatprep.subr.mxu1 %v1348_v0 }
 0x38b   :  { %1269 = vmatprep.subr.mxu0 %v1348_v0  ;;  %1303 = vmatpush3.msra.mxu1 %v1612_v43 }
 0x38c   :  { %1270 = vmatpush3.msra.mxu0 %v1495_v15  ;;  %1307 = vmatprep.subr.mxu1 %v1348_v0 }
 0x38d   :  { %1271 = vmatprep.subr.mxu0 %v1348_v0 }
 0x38e   :  { %1272 = vmatpush3.msra.mxu0 %v1502_v16 }
 0x38f   :  { %1273 = vmatprep.subr.mxu0 %v1348_v0 }
 0x390   :  { %1274 = vmatpush3.msra.mxu0 %v1509_v17 }
 0x391   :  { %1275 = vmatprep.subr.mxu0 %v1348_v0 }
 0x392   :  { %1276 = vmatpush3.msra.mxu0 %v1516_v18 }
 0x393   :  { %1277 = vmatprep.subr.mxu0 %v1348_v0 }
 0x394   :  { %1278 = vmatpush3.msra.mxu0 %v1523_v19 }
 0x395   :  { %1279 = vmatprep.subr.mxu0 %v1348_v0 }
 0x396   :  { %1280 = vmatpush3.msra.mxu0 %v1530_v20 }
 0x397   :  { %1281 = vmatprep.subr.mxu0 %v1348_v0 }
 0x398   :  { %1282 = vmatpush3.msra.mxu0 %v1537_v21 }
 0x399   :  { %1283 = vmatprep.subr.mxu0 %v1348_v0 }
 0x39a   :  { %1284 = vmatpush3.msra.mxu0 %v1544_v22 }
 0x437   :  { %v558_v5 = vpop.f32.mrf.mxu0 }
 0x438   :  { %v559_v6 = vadd.f32 %v1746_v2, %v558_v5 }
 0x439   :  { %v1240_v8 = vpop.f32.mrf.mxu0  ;;  %v723_v36 = vpop.f32.mrf.mxu1 }
 0x43a   :  { %v562_v9 = vmin.f32 %v559_v6, 0.0  ;;  %vm563_vm9 = vcmp.gt.f32.partialorder %v559_v6, 0.0 }
 0x43b   :  { %v641_v10 = vpop.f32.mrf.mxu0  ;;  %v1252_v38 = vpop.f32.mrf.mxu1 }
 0x43c   :  { %v564_v11 = vmul.f32 1.442695, %v562_v9  ;;  %v642_v12 = vadd.f32 %v1553_v23, %v641_v10 }
 0x43d   :  { %v1247_v13 = vpop.f32.mrf.mxu0 }
 0x43e   :  { %1336 = vpow2.f32 %v564_v11  ;;  %v645_v14 = vmin.f32 %v642_v12, 0.0  ;;  %vm646_vm11 = vcmp.gt.f32.partialorder %v642_v12, 0.0 }
 0x440   :  { %v647_v15 = vmul.f32 1.442695, %v645_v14 }
 0x442   :  { %1338 = vpow2.f32 %v647_v15 }
 0x44b   :  { %v1337_v16 = vpop.eup %1336 }
 0x44c   :  { %v1068_v17 = vadd.f32 -1.0, %v1337_v16 }
 0x44e   :  { %v567_v18 = vmul.f32 1.6732632, %v1068_v17 }
 0x44f   :  { %v1339_v19 = vpop.eup %1338 }
 0x450   :  { %v568_v20 = vsel %vm563_vm9, %v559_v6, %v567_v18  ;;  %v1070_v21 = vadd.f32 -1.0, %v1339_v19 }
 0x451   :  { %v569_v22 = vmul.f32 1.050701, %v568_v20 }
 0x452   :  { %v650_v34 = vmul.f32 1.6732632, %v1070_v21 }
 0x453   :  { %571 = vst.msk [vmem:[%s1788_s8] sm:$0xff] %vm570_vm10, %v569_v22 }
 0x454   :  { %v651_v23 = vsel %vm646_vm11, %v642_v12, %v650_v34 }
 0x455   :  { %v652_v35 = vmul.f32 1.050701, %v651_v23 }
 0x457   :  { %1286 = vmatmul.mubr.f32.vlgmr.msra.gmra.mxu0 %v652_v35 }
 0x517   :  { %v793_v40 = vpop.f32.mrf.mxu0 }
 0x518   :  { %v794_v41 = vadd.f32 %v793_v40, %v723_v36 }
 0x519   :  { %v1287_v42 = vpop.f32.mrf.mxu0 }
 0x51a   :  { %v797_v43 = vadd.f32 %v1619_v44, %v794_v41 }
 0x51c   :  { %v798_v50 = vmin.f32 %v797_v43, 0.0  ;;  %vm799_vm12 = vcmp.gt.f32.partialorder %v797_v43, 0.0 }
 0x51e   :  { %v800_v51 = vmul.f32 1.442695, %v798_v50 }
 0x520   :  { %1340 = vpow2.f32 %v800_v51 }
 0x52d   :  { %v1341_v52 = vpop.eup %1340 }
 0x52e   :  { %v1072_v53 = vadd.f32 -1.0, %v1341_v52 }
 0x530   :  { %v803_v54 = vmul.f32 1.6732632, %v1072_v53 }
 0x532   :  { %v804_v55 = vsel %vm799_vm12, %v797_v43, %v803_v54 }
 0x533   :  { %v805_v61 = vmul.f32 1.050701, %v804_v55 }
 0x535   :  { %1305 = vmatmul.mubr.msk.f32.vlgmr.msra.gmra.mxu1 %vm317_vm5, %v805_v61 }
 0x536   :  { %1308 = vmatpush3.msra.mxu1 %v1628_v56  ;;  %1315 = vmatprep.mubr.msk.f32.mxu1 %vm1349_vm0, %v1348_v0 }
 0x537   :  { %1309 = vmatprep.subr.mxu1 %v1348_v0 }
 0x538   :  { %1310 = vmatpush3.msra.mxu1 %v1635_v57 }
 0x539   :  { %1311 = vmatprep.subr.mxu1 %v1348_v0 }
 0x53a   :  { %1312 = vmatpush3.msra.mxu1 %v1642_v58 }
 0x53b   :  { %1313 = vmatprep.subr.mxu1 %v1348_v0 }
 0x53c   :  { %1314 = vmatpush3.msra.mxu1 %v1649_v59 }
 0x53d   :  { %1318 = vmatprep.subr.mxu1 %v1348_v0 }
 0x5f5   :  { %v875_v44 = vpop.f32.mrf.mxu1 }
 0x5f6   :  { %v876_v56 = vadd.f32 %v1656_v60, %v875_v44 }
 0x5f7   :  { %v1306_v62 = vpop.f32.mrf.mxu1 }
 0x5f8   :  { %v879_v63 = vmin.f32 %v876_v56, 0.0  ;;  %vm880_vm13 = vcmp.gt.f32.partialorder %v876_v56, 0.0 }
 0x5fa   :  { %v881_v3 = vmul.f32 1.442695, %v879_v63 }
 0x5fc   :  { %1342 = vpow2.f32 %v881_v3 }
 0x609   :  { %v1343_v4 = vpop.eup %1342 }
 0x60a   :  { %v1074_v7 = vadd.f32 -1.0, %v1343_v4 }
 0x60c   :  { %v884_v57 = vmul.f32 1.6732632, %v1074_v7 }
 0x60e   :  { %v885_v24 = vsel %vm880_vm13, %v876_v56, %v884_v57 }
 0x60f   :  { %v886_v25 = vmul.f32 1.050701, %v885_v24 }
 0x611   :  { %1316 = vmatmul.mubr.msk.f32.vlgmr.msra.gmra.mxu1 %vm403_vm7, %v886_v25 }
 0x612   :  { %1319 = vmatpush3.msra.mxu1 %v1665_v28  ;;  %1322 = vmatprep.mubr.msk.f32.mxu1 %vm1349_vm0, %v1348_v0 }
 0x613   :  { %1320 = vmatprep.subr.mxu1 %v1348_v0 }
 0x614   :  { %1321 = vmatpush3.msra.mxu1 %v1672_v29 }
 0x6d1   :  { %v956_v58 = vpop.f32.mrf.mxu1 }
 0x6d2   :  { %v957_v59 = vadd.f32 %v1679_v30, %v956_v58 }
 0x6d3   :  { %v1317_v60 = vpop.f32.mrf.mxu1 }
 0x6d4   :  { %v960_v26 = vmin.f32 %v957_v59, 0.0  ;;  %vm961_vm14 = vcmp.gt.f32.partialorder %v957_v59, 0.0 }
 0x6d6   :  { %v962_v27 = vmul.f32 1.442695, %v960_v26 }
 0x6d8   :  { %1344 = vpow2.f32 %v962_v27 }
 0x6e5   :  { %v1345_v31 = vpop.eup %1344 }
 0x6e6   :  { %v1076_v32 = vadd.f32 -1.0, %v1345_v31 }
 0x6e8   :  { %v965_v33 = vmul.f32 1.6732632, %v1076_v32 }
 0x6ea   :  { %v966_v37 = vsel %vm961_vm14, %v957_v59, %v965_v33 }
 0x6eb   :  { %v967_v28 = vmul.f32 1.050701, %v966_v37 }
 0x6ed   :  { %1323 = vmatmul.mubr.msk.f32.vlgmr.msra.gmra.mxu1 %vm73_vm1, %v967_v28 }
 0x7ad   :  { %v1037_v39 = vpop.f32.mrf.mxu1 }
 0x7ae   :  { %v1038_v0 = vadd.f32 %v1746_v2, %v1037_v39 }
 0x7af   :  { %v1324_v45 = vpop.f32.mrf.mxu1 }
 0x7b0   :  { %v1041_v29 = vmin.f32 %v1038_v0, 0.0  ;;  %vm1042_vm15 = vcmp.gt.f32.partialorder %v1038_v0, 0.0 }
 0x7b2   :  { %v1043_v46 = vmul.f32 1.442695, %v1041_v29 }
 0x7b4   :  { %1346 = vpow2.f32 %v1043_v46 }
 0x7c1   :  { %v1347_v30 = vpop.eup %1346 }
 0x7c2   :  { %v1078_v47 = vadd.f32 -1.0, %v1347_v30 }
 0x7c4   :  { %v1046_v48 = vmul.f32 1.6732632, %v1078_v47 }
 0x7c6   :  { %v1047_v49 = vsel %vm1042_vm15, %v1038_v0, %v1046_v48 }
 0x7c7   :  { %v1048_v1 = vmul.f32 1.050701, %v1047_v49 }
 0x7c9   :  { %1049 = vst.msk [vmem:[%s1788_s8 + $0x8] sm:$0xff] %vm570_vm10, %v1048_v1 }

</bundles_post_ra>
